<compile_context>
chip_gen: v7x
topology: tpu7x:2x2x1
jax: 0.10.0
libtpu: 0.0.40
codegen_flags: <defaults>
</compile_context>

<pallas_src>
import jax
import jax.numpy as jnp
from jax.experimental import pallas as pl
from jax.experimental.pallas import tpu as pltpu

EPS = 1e-6

_TARGET_BLOCK_BYTES = 16 << 20   # ~16 MiB of input per grid step (amortizes ~0.35us/step)
_VMEM_CLAMP_BYTES = 48 << 20     # safe scoped-VMEM ceiling (v7x physical VMEM is 64 MiB)


def layernorm_kernel(x_ref, a_ref, b_ref, o_ref):
    """x_ref: (rows_tile, D) tile of the flattened input; a_ref/b_ref: (1, D)."""
    x = x_ref[...].astype(jnp.float32)
    d = x.shape[-1]

    # Two-pass statistics: x is already resident in VMEM so the second pass is
    # free (the kernel is HBM-bandwidth bound), and it avoids the catastrophic
    # cancellation of the one-pass sum / sum-of-squares formulation.
    mean = jnp.sum(x, axis=-1, keepdims=True) * (1.0 / d)
    xc = x - mean
    # NOTE: UNBIASED variance (divide by D-1) and eps added to the *std*, to
    # match torch.Tensor.std() and the reference module.  This intentionally
    # differs from jax.nn-style LayerNorms (biased var, eps on the variance).
    var = jnp.sum(xc * xc, axis=-1, keepdims=True) * (1.0 / (d - 1))
    std = jnp.sqrt(var)

    # Exact reciprocal for f32 outputs (DMA is the binding resource, the divide
    # is hidden under HBM time); EUP approx reciprocal is plenty for bf16 I/O.
    approx = o_ref.dtype != jnp.float32
    inv = pl.reciprocal(std + EPS, approx=approx)

    a = a_ref[...].astype(jnp.float32)
    b = b_ref[...].astype(jnp.float32)
    o_ref[...] = (a * (xc * inv) + b).astype(o_ref.dtype)


def _vmem_capacity_bytes():
    try:
        return int(pltpu.get_tpu_info().vmem_capacity_bytes)
    except Exception:
        return 64 * 1024 * 1024  # conservative fallback: v7x per-core VMEM


def _sublane(itemsize):
    # Sub-32-bit dtypes pack along sublanes: 8 for f32, 16 for bf16, 32 for int8/fp8.
    return max(8, 32 // int(itemsize))


def _round_up(n, m):
    return ((n + m - 1) // m) * m


def _pick_rows_tile(n_rows, d, itemsize):
    """Row tile sized by a byte target and an explicit VMEM budget."""
    sub = _sublane(itemsize)
    rows_needed = _round_up(n_rows, sub)

    # Byte target per block: large enough that the ~0.35us per-grid-step
    # overhead is <~5% of the DMA time even at v7x HBM bandwidth.
    rows_target = max(sub, _TARGET_BLOCK_BYTES // (d * itemsize))

    # Explicit VMEM accounting: (in + out) double-buffered in the I/O dtype,
    # plus ~1.5 blocks of f32 temporaries when the I/O dtype is narrower than
    # f32 (the kernel upcasts the whole tile), plus resident a/b tiles and
    # ~2 MiB of compiler scratch.
    vmem = min(_vmem_capacity_bytes(), _VMEM_CLAMP_BYTES)
    per_row = 2 * 2 * d * itemsize
    if itemsize < 4:
        per_row += (3 * d * 4) // 2
    overhead = (2 << 20) + 8 * d * 4
    rows_vmem = max(sub, (vmem - overhead) // per_row)

    rows = min(rows_target, rows_vmem)
    rows = max(sub, (rows // sub) * sub)

    if rows >= rows_needed:
        # Whole problem fits a single block.  If it is large enough to be worth
        # splitting, use >=2 grid steps so v7x's two TensorCores both work and
        # double-buffered pipelining stays enabled; otherwise one block wins.
        rows = rows_needed
        if rows_needed >= 2 * sub and n_rows * d * itemsize > (1 << 20):
            rows = _round_up(pl.cdiv(rows_needed, 2), sub)
    else:
        # Prefer an even grid-step count for v7x core balance.
        g = pl.cdiv(n_rows, rows)
        if g > 1 and g % 2 == 1:
            rows = max(sub, _round_up(pl.cdiv(rows_needed, g + 1), sub))
    return rows


def pallas_layernorm_2d(x2d, a_2, b_2, rows_tile=None):
    """x2d: (R, D); a_2/b_2: (D,).  Compute in f32, output in x2d.dtype."""
    R, D = x2d.shape
    assert D >= 2, "LayerNorm with a single feature divides by zero (unbiased std uses D-1)."
    out_dtype = x2d.dtype
    itemsize = jnp.dtype(x2d.dtype).itemsize
    if rows_tile is None:
        rows_tile = _pick_rows_tile(R, D, itemsize)

    a2d = a_2.reshape(1, D)
    b2d = b_2.reshape(1, D)

    # No padding / slicing: the ragged last block is handled by Pallas (OOB
    # reads are padded, OOB stores are masked; every row is independent so the
    # garbage rows never reach HBM).
    grid = int(pl.cdiv(R, rows_tile))

    # Scoped-VMEM request: double-buffered in/out tiles (+ f32 cast copies for
    # sub-f32 I/O) + resident param tiles + compiler-scratch margin, clamped so
    # the same request is valid on v7x's 64 MiB VMEM.
    per_block = rows_tile * D * itemsize
    f32_tmp = (3 * rows_tile * D * 4) // 2 if itemsize < 4 else 0
    need = 2 * 2 * per_block + f32_tmp + 8 * D * 4 + (2 << 20)
    vmem_limit = int(min(min(_vmem_capacity_bytes(), _VMEM_CLAMP_BYTES),
                         max(need + (2 << 20), 16 << 20)))

    return pl.pallas_call(
        layernorm_kernel,
        out_shape=jax.ShapeDtypeStruct((R, D), out_dtype),
        grid_spec=pltpu.PrefetchScalarGridSpec(
            num_scalar_prefetch=0,
            grid=(grid,),
            in_specs=[
                pl.BlockSpec((rows_tile, D), lambda i: (i, 0)),
                pl.BlockSpec((1, D), lambda i: (0, 0)),  # resident across the grid
                pl.BlockSpec((1, D), lambda i: (0, 0)),
            ],
            out_specs=pl.BlockSpec((rows_tile, D), lambda i: (i, 0)),
        ),
        compiler_params=pltpu.CompilerParams(
            # "parallel" lets the row tiles shard across both TensorCores on v7x.
            dimension_semantics=("parallel",),
            vmem_limit_bytes=vmem_limit,
        ),
    )(x2d, a2d, b2d)


def layernorm(x, a_2, b_2, rows_tile=None):
    """LayerNorm.forward(x) for x of shape (..., D)."""
    D = x.shape[-1]
    lead = x.shape[:-1]
    y2d = pallas_layernorm_2d(x.reshape(-1, D), a_2, b_2, rows_tile=rows_tile)
    return y2d.reshape(*lead, D)


if __name__ == "__main__":
    # Small transformer-ish shape with a lane-dense feature dim (multiple of 128).
    B, S, D = 2, 8, 128

    key = jax.random.PRNGKey(0)
    x = jax.random.normal(key, (B, S, D), dtype=jnp.float32)

    # Deterministic init per the module's __init__: a_2 = ones, b_2 = zeros.
    a_2 = jnp.ones((D,), dtype=jnp.float32)
    b_2 = jnp.zeros((D,), dtype=jnp.float32)

    def ref_ln(xf):
        mean = jnp.mean(xf, axis=-1, keepdims=True)
        std = jnp.sqrt(jnp.sum((xf - mean) ** 2, axis=-1, keepdims=True) / (D - 1))
        return a_2 * (xf - mean) / (std + EPS) + b_2

    # f32 path — two-pass stats + exact reciprocal => tight tolerance.
    out = jax.block_until_ready(layernorm(x, a_2, b_2))
    ref = ref_ln(x)
    assert out.shape == x.shape and out.dtype == x.dtype
    assert jnp.allclose(out, ref, atol=1e-4, rtol=1e-4), float(jnp.max(jnp.abs(out - ref)))

    # Ragged multi-block path (R not a multiple of rows_tile): no pad/slice,
    # Pallas masks the out-of-bounds rows of the last block.
    xr = jax.random.normal(jax.random.PRNGKey(1), (20, D), dtype=jnp.float32)
    outr = jax.block_until_ready(pallas_layernorm_2d(xr, a_2, b_2, rows_tile=8))
    assert jnp.allclose(outr, ref_ln(xr), atol=1e-4, rtol=1e-4)

    # bf16 I/O path (halves HBM traffic on the mem-bound kernel; compute stays f32).
    xb = x.astype(jnp.bfloat16)
    outb = jax.block_until_ready(layernorm(xb, a_2, b_2))
    assert outb.dtype == jnp.bfloat16
    ref_b = ref_ln(xb.astype(jnp.float32))
    assert jnp.allclose(outb.astype(jnp.float32), ref_b, atol=2e-2, rtol=2e-2)

    print("KERNEL_OK")
</pallas_src>

<mosaic_0001>
module attributes {stable_mosaic.version = 11 : i64} {
  func.func @layernorm_kernel(%arg0: i32, %arg1: memref<16x128xf32, #tpu.memory_space<vmem>>, %arg2: memref<1x128xf32, #tpu.memory_space<vmem>>, %arg3: memref<1x128xf32, #tpu.memory_space<vmem>>, %arg4: memref<16x128xf32, #tpu.memory_space<vmem>>) attributes {dimension_semantics = [#tpu.dimension_semantics<parallel>], iteration_bounds = array<i64: 1>, scalar_prefetch = 0 : i64, scratch_operands = 0 : i64, tpu.core_type = #tpu.core_type<tc>, window_params = [{transform_indices = @transform_0, window_bounds = array<i64: 16, 128>}, {pipeline_mode = #tpu.pipeline_mode<synchronous>, transform_indices = @transform_1, window_bounds = array<i64: 1, 128>}, {pipeline_mode = #tpu.pipeline_mode<synchronous>, transform_indices = @transform_2, window_bounds = array<i64: 1, 128>}, {transform_indices = @transform_3, window_bounds = array<i64: 16, 128>}]} {
    %c0 = arith.constant 0 : index
    %c0_0 = arith.constant 0 : index
    %0 = vector.load %arg1[%c0, %c0_0] : memref<16x128xf32, #tpu.memory_space<vmem>>, vector<16x128xf32>
    %cst = arith.constant dense<0.000000e+00> : vector<16xf32>
    %1 = vector.multi_reduction <add>, %0, %cst [1] : vector<16x128xf32> to vector<16xf32>
    %2 = vector.shape_cast %1 : vector<16xf32> to vector<16x1xf32>
    %cst_1 = arith.constant 7.812500e-03 : f32
    %3 = vector.broadcast %cst_1 : f32 to vector<16x1xf32>
    %4 = arith.mulf %2, %3 : vector<16x1xf32>
    %5 = vector.broadcast %4 : vector<16x1xf32> to vector<16x128xf32>
    %6 = arith.subf %0, %5 : vector<16x128xf32>
    %7 = arith.mulf %6, %6 : vector<16x128xf32>
    %cst_2 = arith.constant dense<0.000000e+00> : vector<16xf32>
    %8 = vector.multi_reduction <add>, %7, %cst_2 [1] : vector<16x128xf32> to vector<16xf32>
    %9 = vector.shape_cast %8 : vector<16xf32> to vector<16x1xf32>
    %cst_3 = arith.constant 0.00787401571 : f32
    %10 = vector.broadcast %cst_3 : f32 to vector<16x1xf32>
    %11 = arith.mulf %9, %10 : vector<16x1xf32>
    %12 = math.sqrt %11 : vector<16x1xf32>
    %cst_4 = arith.constant 9.99999997E-7 : f32
    %13 = vector.broadcast %cst_4 : f32 to vector<16x1xf32>
    %14 = arith.addf %12, %13 : vector<16x1xf32>
    %15 = tpu.reciprocal %14 : vector<16x1xf32> -> vector<16x1xf32>
    %c0_5 = arith.constant 0 : index
    %c0_6 = arith.constant 0 : index
    %16 = vector.load %arg2[%c0_5, %c0_6] : memref<1x128xf32, #tpu.memory_space<vmem>>, vector<1x128xf32>
    %c0_7 = arith.constant 0 : index
    %c0_8 = arith.constant 0 : index
    %17 = vector.load %arg3[%c0_7, %c0_8] : memref<1x128xf32, #tpu.memory_space<vmem>>, vector<1x128xf32>
    %18 = vector.broadcast %15 : vector<16x1xf32> to vector<16x128xf32>
    %19 = arith.mulf %6, %18 : vector<16x128xf32>
    %20 = vector.broadcast %16 : vector<1x128xf32> to vector<16x128xf32>
    %21 = arith.mulf %20, %19 : vector<16x128xf32>
    %22 = vector.broadcast %17 : vector<1x128xf32> to vector<16x128xf32>
    %23 = arith.addf %21, %22 : vector<16x128xf32>
    %c0_9 = arith.constant 0 : index
    %c0_10 = arith.constant 0 : index
    %24 = vector.load %arg4[%c0_9, %c0_10] : memref<16x128xf32, #tpu.memory_space<vmem>>, vector<16x128xf32>
    tpu.vector_store %arg4[%c0_9, %c0_10], %23 {strides = array<i32>} : memref<16x128xf32, #tpu.memory_space<vmem>>, vector<16x128xf32>,
    return
  }
  func.func @transform_0(%arg0: i32) -> (i32, i32) {
    %c0_i32 = arith.constant 0 : i32
    %c0_i32_0 = arith.constant 0 : i32
    return %arg0, %c0_i32 : i32, i32
  }
  func.func @transform_1(%arg0: i32) -> (i32, i32) {
    %c0_i32 = arith.constant 0 : i32
    %c0_i32_0 = arith.constant 0 : i32
    %c0_i32_1 = arith.constant 0 : i32
    return %c0_i32, %c0_i32_0 : i32, i32
  }
  func.func @transform_2(%arg0: i32) -> (i32, i32) {
    %c0_i32 = arith.constant 0 : i32
    %c0_i32_0 = arith.constant 0 : i32
    %c0_i32_1 = arith.constant 0 : i32
    return %c0_i32, %c0_i32_0 : i32, i32
  }
  func.func @transform_3(%arg0: i32) -> (i32, i32) {
    %c0_i32 = arith.constant 0 : i32
    %c0_i32_0 = arith.constant 0 : i32
    return %arg0, %c0_i32 : i32, i32
  }
}

</mosaic_0001>

<bundles_post_ra>
// kernel: tpu_custom_call.1
= control target key start
LH: loop header
LB: loop body
LE: loop exit
PB: predicated region body
PF: predicated region fallthrough
CT: control target
= control target key end

     0   :  { %8 = vsyncpa [#allocation3], 0  ;;  %s226_s0 = inlined_call_operand.hbm [shape: f32[16,128], index: 0, kind: input, shape index: {}]   ;;  %s227_s1 = inlined_call_operand.vmem [shape: f32[1,128], index: 1, kind: input, shape index: {}]   ;;  %s228_s2 = inlined_call_operand.vmem [shape: f32[1,128], index: 2, kind: input, shape index: {}]   ;;  %s229_s3 = inlined_call_operand.hbm [shape: f32[16,128], index: 3, kind: output, shape index: {}]  }
   0x1   :  { %9 = vsyncpa [#allocation4], 0  ;;  %s166_s12 = smov [#allocation2]   ;;  %s118_s16 = scalar_lea.hbm %s226_s0, 256 }
   0x2   :  { %s15_s13 = sshll.u32 %s166_s12, 4  ;;  %p119_p0 = scmp.ne.s32.totalorder %s226_s0, %s118_s16  ;;  %s16_s13 = int_to_ptr.vmem [resolvable:$true] %s15_s13 }
   0x3   :  { %p122_p1 = scmp.lt.u32.totalorder %s118_s16, %s226_s0 }
   0x5   :  { %p124_p2 = pnand %p122_p1, %p119_p0 }
   0x7   :  { %127 = shalt.err (!%p124_p2)
}
   0x8   :  { %s128_s21 = scalar_lea.vmem %s16_s13, 256  ;;  %p133_p4 = scmp.lt.s32.totalorder %s16_s13, %s16_s13 }
   0x9   :  { %p129_p3 = scmp.ne.s32.totalorder %s16_s13, %s128_s21  ;;  %p134_p5 = scmp.lt.s32.totalorder %s128_s21, %s128_s21 }
   0xb   :  { %p135_p6 = por %p134_p5, %p133_p4 }
   0xd   :  { %p136_p7 = pnand %p135_p6, %p129_p3 }
   0xf   :  { %139 = shalt.err (!%p136_p7)
}
  0x10   :  { %s167_s22 = smov 128   ;;  %s168_s23 = smov 8  }
  0x11   :  { %21 = dma.hbm_to_vmem [thread:$0]  %s226_s0, 256, %s16_s13, [#allocation3], %s167_s22, %s167_s22, %s168_s23  }
  0x12   :  { %162 = dma.done.wait [#allocation3], 256  }
  0x13   :  { %163 = vsyncadd [#allocation3], 4294967040  ;;  %v29_v0 = vld [vmem:[#allocation2] sm:$0xff]  ;;  %v30_v1 = vld [vmem:[#allocation2 + $0x8] sm:$0xff]  ;;  %s169_s29 = smov [#allocation5]  }
  0x14   :  { %31 = vadd.xlane.f32.xlu0 %v29_v0  ;;  %v104_v27 = vld [vmem:[%s227_s1] ss:$0 sm:$0xff]  ;;  %s92_s30 = sshll.u32 %s169_s29, 4  ;;  %s93_s30 = int_to_ptr.vmem [resolvable:$true] %s92_s30 }
  0x15   :  { %v105_v29 = vld [vmem:[%s228_s2] ss:$0 sm:$0xff]  ;;  %s140_s4 = scalar_lea.vmem %s93_s30, 256  ;;  %p145_p9 = scmp.lt.s32.totalorder %s93_s30, %s93_s30 }
  0x16   :  { %p141_p8 = scmp.ne.s32.totalorder %s93_s30, %s140_s4  ;;  %p146_p10 = scmp.lt.s32.totalorder %s140_s4, %s140_s4 }
  0x18   :  { %33 = vadd.xlane.f32.xlu0 %v30_v1  ;;  %p147_p11 = por %p146_p10, %p145_p9 }
  0x1a   :  { %p148_p12 = pnand %p147_p11, %p141_p8 }
  0xa1   :  { %v32_v2 = vpop.xlane.xlu0 %31 }
  0xa2   :  { %v35_v3 = vmul.f32 0.0078125, %v32_v2 }
  0xa4   :  { %v37_v4 = vsub.f32 %v29_v0, %v35_v3 }
  0xa5   :  { %v34_v5 = vpop.xlane.xlu0 %33 }
  0xa6   :  { %v36_v6 = vmul.f32 0.0078125, %v34_v5  ;;  %v39_v7 = vmul.f32 %v37_v4, %v37_v4 }
  0xa8   :  { %v38_v8 = vsub.f32 %v30_v1, %v36_v6  ;;  %41 = vadd.xlane.f32.xlu1 %v39_v7 }
  0xaa   :  { %v40_v9 = vmul.f32 %v38_v8, %v38_v8 }
  0xac   :  { %43 = vadd.xlane.f32.xlu1 %v40_v9 }
 0x135   :  { %v42_v10 = vpop.xlane.xlu1 %41 }
 0x136   :  { %v45_v11 = vmul.f32 0.007874016, %v42_v10 }
 0x138   :  { %110 = vrsqrt.f32 %v45_v11  ;;  %vm49_vm0 = vcmp.eq.f32.partialorder %v45_v11, inf  ;;  %v52_v16 = vand.u32 2147483648, %v45_v11  ;;  %vm51_vm1 = vcmp.eq.f32.partialorder %v45_v11, 0.0 }
 0x139   :  { %v44_v12 = vpop.xlane.xlu1 %43 }
 0x13a   :  { %v46_v13 = vmul.f32 0.007874016, %v44_v12 }
 0x13c   :  { %112 = vrsqrt.f32 %v46_v13  ;;  %vm56_vm2 = vcmp.eq.f32.partialorder %v46_v13, inf  ;;  %v59_v22 = vand.u32 2147483648, %v46_v13  ;;  %vm58_vm3 = vcmp.eq.f32.partialorder %v46_v13, 0.0 }
 0x142   :  { %v111_v14 = vpop.eup %110 }
 0x143   :  { %v48_v15 = vmul.f32 %v111_v14, %v45_v11 }
 0x145   :  { %v50_v17 = vsel %vm49_vm0, %v45_v11, %v48_v15 }
 0x146   :  { %v113_v18 = vpop.eup %112  ;;  %v53_v19 = vsel %vm51_vm1, %v52_v16, %v50_v17 }
 0x147   :  { %v55_v20 = vmul.f32 %v113_v18, %v46_v13  ;;  %v61_v21 = vadd.f32 1e-06, %v53_v19 }
 0x149   :  { %v57_v23 = vsel %vm56_vm2, %v46_v13, %v55_v20  ;;  %114 = vrcp.f32 %v61_v21 }
 0x14a   :  { %v60_v24 = vsel %vm58_vm3, %v59_v22, %v57_v23 }
 0x14b   :  { %v62_v25 = vadd.f32 1e-06, %v60_v24 }
 0x14d   :  { %116 = vrcp.f32 %v62_v25 }
 0x153   :  { %v115_v26 = vpop.eup %114 }
 0x154   :  { %v67_v28 = vmul.f32 %v115_v26, %v37_v4 }
 0x156   :  { %v75_v30 = vmul.f32 %v104_v27, %v67_v28 }
 0x157   :  { %v117_v31 = vpop.eup %116 }
 0x158   :  { %v68_v32 = vmul.f32 %v117_v31, %v38_v8  ;;  %v83_v33 = vadd.f32 %v105_v29, %v75_v30 }
 0x15a   :  { %v76_v34 = vmul.f32 %v104_v27, %v68_v32  ;;  %85 = vst [vmem:[#allocation5] sm:$0xff] %v83_v33 }
 0x15c   :  { %v84_v35 = vadd.f32 %v105_v29, %v76_v34 }
 0x15e   :  { %86 = vst [vmem:[#allocation5 + $0x8] sm:$0xff] %v84_v35 }
 0x15f   :  { %151 = shalt.err (!%p148_p12)
}
 0x160   :  { %s152_s5 = scalar_lea.hbm %s229_s3, 256 }
 0x161   :  { %p153_p13 = scmp.ne.s32.totalorder %s229_s3, %s152_s5  ;;  %p156_p0 = scmp.lt.u32.totalorder %s152_s5, %s229_s3 }
 0x163   :  { %p158_p1 = pnand %p156_p0, %p153_p13 }
 0x165   :  { %161 = shalt.err (!%p158_p1)
}
 0x166   :  { %98 = dma.vmem_to_hbm [thread:$0]  %s93_s30, 256, %s229_s3, [#allocation4], %s167_s22, %s167_s22, %s168_s23  }
 0x167   :  { %164 = dma.done.wait [#allocation4], 256  }
 0x168   :  { %165 = vsyncadd [#allocation4], 4294967040 }
 0x169   :  { %102 = vsyncpa [#allocation3], 1 }
 0x16a   :  { %103 = vsyncpa [#allocation4], 1 }

</bundles_post_ra>
